<compile_context>
chip_gen: v7x
topology: tpu7x:2x2x1
jax: 0.10.0
libtpu: 0.0.40
codegen_flags: <defaults>
</compile_context>

<pallas_src>
import functools

import jax
import jax.numpy as jnp
import numpy as np
from jax import lax
from jax.experimental import pallas as pl
from jax.experimental.pallas import tpu as pltpu


_LANES = 512           # lane-dense last dim (multiple of 128)
_MAX_TILE_ROWS = 256   # 256*512*4B = 512 KiB / buffer -> safe for v7x VMEM


def _i32(x: int) -> jnp.int32:
    """int32 constant from an unsigned 32-bit literal (two's complement)."""
    if x >= (1 << 31):
        x -= 1 << 32
    return jnp.int32(x)


def _round_up(x: int, m: int) -> int:
    return ((x + m - 1) // m) * m


def _poisson_kernel(seed_ref, rate_ref, out_ref, *, dt):
    tile_r, cols = rate_ref.shape

    # Global element index of every lane in the padded (rows, cols) slab, so
    # different grid tiles never reuse a random stream.
    row = lax.broadcasted_iota(jnp.int32, (tile_r, cols), 0)
    col = lax.broadcasted_iota(jnp.int32, (tile_r, cols), 1)
    idx = (row + pl.program_id(0) * tile_r) * cols + col

    # Counter-based hash RNG (lowbias32): 32 well-mixed bits per element from
    # (seed, global index) using only int32 mul / xor / logical shifts.
    x = idx ^ (seed_ref[0] * _i32(0x9E3779B9))
    x = (x ^ lax.shift_right_logical(x, 16)) * _i32(0x7FEB352D)
    x = (x ^ lax.shift_right_logical(x, 15)) * _i32(0x846CA68B)
    x = x ^ lax.shift_right_logical(x, 16)

    # Top 24 bits -> uniform integer in [0, 2^24).  Fold dt and the 2^-24
    # scale into a single threshold multiply:  u < rate*dt  <=>
    # u24 < rate * (dt * 2^24).
    u24 = lax.shift_right_logical(x, 8).astype(jnp.float32)
    threshold = rate_ref[...] * jnp.float32(dt * 16777216.0)
    out_ref[...] = (u24 < threshold).astype(jnp.float32)


def poisson_spikes(rate: jax.Array, seed, dt: float = 1.0) -> jax.Array:
    """Pallas equivalent of PoissonNeuron.forward (returns `spikes`).

    The return value is also the new `spike_history`; callers should pass a
    fresh `seed` every timestep (matching torch.rand_like's fresh draws).
    """
    orig_shape = rate.shape
    total = int(np.prod(orig_shape)) if orig_shape else 1
    rate_flat = rate.astype(jnp.float32).reshape(-1)

    # Lane-dense re-view: (rows, 512), rows padded so the row-tile divides it.
    rows = _round_up(total, _LANES) // _LANES
    tile_r = _MAX_TILE_ROWS if rows >= _MAX_TILE_ROWS else _round_up(rows, 8)
    rows_p = _round_up(rows, tile_r)
    n_pad = rows_p * _LANES

    rate2d = jnp.pad(rate_flat, (0, n_pad - total)).reshape(rows_p, _LANES)
    seed_arr = jnp.asarray([seed], dtype=jnp.int32)

    kernel = functools.partial(_poisson_kernel, dt=float(dt))
    out2d = pl.pallas_call(
        kernel,
        out_shape=jax.ShapeDtypeStruct((rows_p, _LANES), jnp.float32),
        grid_spec=pltpu.PrefetchScalarGridSpec(
            num_scalar_prefetch=1,            # seed lands in SMEM
            grid=(rows_p // tile_r,),
            in_specs=[pl.BlockSpec((tile_r, _LANES), lambda i, seed: (i, 0))],
            out_specs=pl.BlockSpec((tile_r, _LANES), lambda i, seed: (i, 0)),
        ),
        compiler_params=pltpu.CompilerParams(
            dimension_semantics=("parallel",),   # shard tiles across v7x's 2 TCs
        ),
    )(seed_arr, rate2d)

    # Strip the padding tail before restoring the original neuron shape.
    return out2d.reshape(-1)[:total].reshape(orig_shape)


if __name__ == "__main__":
    key = jax.random.PRNGKey(0)
    # Neuron shape consistent with an image-encoded input: (2, 4, 16, 16)
    neuron_shape = (2, 4, 16, 16)
    # Rates in [0, 1) so rate * dt is a valid spike probability.
    rate = jax.random.uniform(key, neuron_shape, dtype=jnp.float32)

    spikes = poisson_spikes(rate, seed=1234, dt=1.0)
    spikes = jax.block_until_ready(spikes)

    assert spikes.shape == neuron_shape
    assert spikes.dtype == jnp.float32
    # spikes must be binary {0, 1}
    assert bool(jnp.all((spikes == 0.0) | (spikes == 1.0)))
    # Empirical firing rate should track the mean Bernoulli probability.
    assert abs(float(spikes.mean()) - float(rate.mean())) < 0.1

    print("KERNEL_OK")
</pallas_src>

<mosaic_0001>
module attributes {stable_mosaic.version = 11 : i64} {
  func.func @_poisson_kernel(%arg0: i32, %arg1: memref<1xi32, #tpu.memory_space<smem>>, %arg2: memref<8x512xf32, #tpu.memory_space<vmem>>, %arg3: memref<8x512xf32, #tpu.memory_space<vmem>>) attributes {dimension_semantics = [#tpu.dimension_semantics<parallel>], iteration_bounds = array<i64: 1>, scalar_prefetch = 1 : i64, scratch_operands = 0 : i64, tpu.core_type = #tpu.core_type<tc>, window_params = [{transform_indices = @transform_0, window_bounds = array<i64: 8, 512>}, {transform_indices = @transform_1, window_bounds = array<i64: 8, 512>}]} {
    %0 = tpu.iota {dimensions = array<i32: 0>} : vector<8x512xi32>
    %1 = tpu.iota {dimensions = array<i32: 1>} : vector<8x512xi32>
    %c8_i32 = arith.constant 8 : i32
    %2 = arith.muli %arg0, %c8_i32 : i32
    %3 = vector.broadcast %2 : i32 to vector<8x512xi32>
    %4 = arith.addi %0, %3 : vector<8x512xi32>
    %c512_i32 = arith.constant 512 : i32
    %5 = vector.broadcast %c512_i32 : i32 to vector<8x512xi32>
    %6 = arith.muli %4, %5 : vector<8x512xi32>
    %7 = arith.addi %6, %1 : vector<8x512xi32>
    %c0 = arith.constant 0 : index
    %8 = memref.load %arg1[%c0] : memref<1xi32, #tpu.memory_space<smem>>
    %c-1640531527_i32 = arith.constant -1640531527 : i32
    %9 = arith.muli %8, %c-1640531527_i32 : i32
    %10 = vector.broadcast %9 : i32 to vector<8x512xi32>
    %11 = arith.xori %7, %10 : vector<8x512xi32>
    %c16_i32 = arith.constant 16 : i32
    %12 = vector.broadcast %c16_i32 : i32 to vector<8x512xi32>
    %13 = arith.shrui %11, %12 : vector<8x512xi32>
    %14 = arith.xori %11, %13 : vector<8x512xi32>
    %c2146121005_i32 = arith.constant 2146121005 : i32
    %15 = vector.broadcast %c2146121005_i32 : i32 to vector<8x512xi32>
    %16 = arith.muli %14, %15 : vector<8x512xi32>
    %c15_i32 = arith.constant 15 : i32
    %17 = vector.broadcast %c15_i32 : i32 to vector<8x512xi32>
    %18 = arith.shrui %16, %17 : vector<8x512xi32>
    %19 = arith.xori %16, %18 : vector<8x512xi32>
    %c-2073254261_i32 = arith.constant -2073254261 : i32
    %20 = vector.broadcast %c-2073254261_i32 : i32 to vector<8x512xi32>
    %21 = arith.muli %19, %20 : vector<8x512xi32>
    %c16_i32_0 = arith.constant 16 : i32
    %22 = vector.broadcast %c16_i32_0 : i32 to vector<8x512xi32>
    %23 = arith.shrui %21, %22 : vector<8x512xi32>
    %24 = arith.xori %21, %23 : vector<8x512xi32>
    %c8_i32_1 = arith.constant 8 : i32
    %25 = vector.broadcast %c8_i32_1 : i32 to vector<8x512xi32>
    %26 = arith.shrui %24, %25 : vector<8x512xi32>
    %27 = arith.sitofp %26 : vector<8x512xi32> to vector<8x512xf32>
    %c0_2 = arith.constant 0 : index
    %c0_3 = arith.constant 0 : index
    %28 = vector.load %arg2[%c0_2, %c0_3] : memref<8x512xf32, #tpu.memory_space<vmem>>, vector<8x512xf32>
    %cst = arith.constant 0x4B800000 : f32
    %29 = vector.broadcast %cst : f32 to vector<8x512xf32>
    %30 = arith.mulf %28, %29 : vector<8x512xf32>
    %31 = arith.cmpf olt, %27, %30 : vector<8x512xf32>
    %32 = arith.extui %31 : vector<8x512xi1> to vector<8x512xi32>
    %33 = arith.sitofp %32 : vector<8x512xi32> to vector<8x512xf32>
    %c0_4 = arith.constant 0 : index
    %c0_5 = arith.constant 0 : index
    %34 = vector.load %arg3[%c0_4, %c0_5] : memref<8x512xf32, #tpu.memory_space<vmem>>, vector<8x512xf32>
    tpu.vector_store %arg3[%c0_4, %c0_5], %33 {strides = array<i32>} : memref<8x512xf32, #tpu.memory_space<vmem>>, vector<8x512xf32>,
    return
  }
  func.func @transform_0(%arg0: i32, %arg1: memref<1xi32, #tpu.memory_space<smem>>) -> (i32, i32) {
    %c0_i32 = arith.constant 0 : i32
    %c0_i32_0 = arith.constant 0 : i32
    return %arg0, %c0_i32 : i32, i32
  }
  func.func @transform_1(%arg0: i32, %arg1: memref<1xi32, #tpu.memory_space<smem>>) -> (i32, i32) {
    %c0_i32 = arith.constant 0 : i32
    %c0_i32_0 = arith.constant 0 : i32
    return %arg0, %c0_i32 : i32, i32
  }
}

</mosaic_0001>

<bundles_post_ra>
// kernel: tpu_custom_call.1
= control target key start
LH: loop header
LB: loop body
LE: loop exit
PB: predicated region body
PF: predicated region fallthrough
CT: control target
= control target key end

     0   :  { %8 = vsyncpa [#allocation5], 0  ;;  %s224_s0 = inlined_call_operand.<no memory space> [shape: s32[1], index: 0, kind: input, shape index: {}]   ;;  %s225_s1 = inlined_call_operand.hbm [shape: f32[8,512], index: 1, kind: input, shape index: {}]   ;;  %s226_s2 = inlined_call_operand.hbm [shape: f32[8,512], index: 2, kind: output, shape index: {}]  }
   0x1   :  { %9 = vsyncpa [#allocation6], 0  ;;  %s179_s9 = smov [#allocation4]   ;;  %s131_s13 = scalar_lea.hbm %s225_s1, 512 }
   0x2   :  { %s16_s10 = sshll.u32 %s179_s9, 4  ;;  %p132_p0 = scmp.ne.s32.totalorder %s225_s1, %s131_s13  ;;  %s17_s10 = int_to_ptr.vmem [resolvable:$true] %s16_s10 }
   0x3   :  { %p135_p1 = scmp.lt.u32.totalorder %s131_s13, %s225_s1 }
   0x5   :  { %p137_p2 = pnand %p135_p1, %p132_p0 }
   0x7   :  { %140 = shalt.err (!%p137_p2)
}
   0x8   :  { %s141_s18 = scalar_lea.vmem %s17_s10, 512  ;;  %p146_p4 = scmp.lt.s32.totalorder %s17_s10, %s17_s10 }
   0x9   :  { %p142_p3 = scmp.ne.s32.totalorder %s17_s10, %s141_s18  ;;  %p147_p5 = scmp.lt.s32.totalorder %s141_s18, %s141_s18 }
   0xb   :  { %p148_p6 = por %p147_p5, %p146_p4 }
   0xd   :  { %p149_p7 = pnand %p148_p6, %p142_p3 }
   0xf   :  { %152 = shalt.err (!%p149_p7)
}
  0x10   :  { %19 = dma.hbm_to_vmem [thread:$0]  %s225_s1, 512, %s17_s10, [#allocation5]  }
  0x11   :  { %175 = dma.done.wait [#allocation5], 512  }
  0x12   :  { %176 = vsyncadd [#allocation5], 4294966784  ;;  %v23_v0 = vlaneseq  ;;  %s39_s23 = smul.u32 2654435769, %s224_s0  ;;  %v85_v42 = vld [vmem:[#allocation4] sm:$0xff]  ;;  %v86_v43 = vld [vmem:[#allocation4 + $0x8] sm:$0xff] }
  0x13   :  { %v87_v48 = vld [vmem:[#allocation4 + $0x10] sm:$0xff]  ;;  %v88_v49 = vld [vmem:[#allocation4 + $0x18] sm:$0xff]  ;;  %v89_v53 = vmul.f32 16777216.0, %v85_v42  ;;  %v90_v55 = vmul.f32 16777216.0, %v86_v43  ;;  %s180_s0 = smov [#allocation7]  }
  0x14   :  { %v24_v1 = vshrl.u32 %v23_v0, 7  ;;  %v26_v2 = vand.u32 127, %v23_v0  ;;  %v40_v7 = vstv %s39_s23  ;;  %v91_v57 = vmul.f32 16777216.0, %v87_v48  ;;  %s115_s1 = sshll.u32 %s180_s0, 4  ;;  %s116_s1 = int_to_ptr.vmem [resolvable:$true] %s115_s1 }
  0x15   :  { %v92_v59 = vmul.f32 16777216.0, %v88_v49  ;;  %v181_v0 = vmov 0.0   ;;  %s153_s24 = scalar_lea.vmem %s116_s1, 512  ;;  %p158_p9 = scmp.lt.s32.totalorder %s116_s1, %s116_s1 }
  0x16   :  { %v33_v3 = vmul.u32 512, %v24_v1  ;;  %v27_v4 = vadd.s32 128, %v26_v2  ;;  %v28_v5 = vadd.s32 256, %v26_v2  ;;  %v29_v6 = vadd.s32 384, %v26_v2  ;;  %p154_p8 = scmp.ne.s32.totalorder %s116_s1, %s153_s24  ;;  %p159_p10 = scmp.lt.s32.totalorder %s153_s24, %s153_s24 }
  0x18   :  { %v34_v8 = vadd.s32 %v33_v3, %v26_v2  ;;  %v35_v9 = vadd.s32 %v33_v3, %v27_v4  ;;  %v36_v10 = vadd.s32 %v33_v3, %v28_v5  ;;  %v37_v11 = vadd.s32 %v33_v3, %v29_v6  ;;  %p160_p11 = por %p159_p10, %p158_p9 }
  0x1a   :  { %v41_v12 = vxor.u32 %v40_v7, %v34_v8  ;;  %v42_v13 = vxor.u32 %v40_v7, %v35_v9  ;;  %v43_v14 = vxor.u32 %v40_v7, %v36_v10  ;;  %v44_v15 = vxor.u32 %v40_v7, %v37_v11  ;;  %p161_p12 = pnand %p160_p11, %p154_p8 }
  0x1c   :  { %v45_v16 = vshrl.u32 %v41_v12, 16  ;;  %v46_v17 = vshrl.u32 %v42_v13, 16  ;;  %v47_v18 = vshrl.u32 %v43_v14, 16  ;;  %v48_v19 = vshrl.u32 %v44_v15, 16 }
  0x1e   :  { %v49_v20 = vxor.u32 %v45_v16, %v41_v12  ;;  %v50_v21 = vxor.u32 %v46_v17, %v42_v13  ;;  %v51_v22 = vxor.u32 %v47_v18, %v43_v14  ;;  %v52_v23 = vxor.u32 %v48_v19, %v44_v15 }
  0x20   :  { %v53_v24 = vmul.u32 2146121005, %v49_v20  ;;  %v54_v25 = vmul.u32 2146121005, %v50_v21 }
  0x21   :  { %v55_v26 = vmul.u32 2146121005, %v51_v22  ;;  %v56_v27 = vmul.u32 2146121005, %v52_v23 }
  0x22   :  { %v57_v28 = vshrl.u32 %v53_v24, 15  ;;  %v58_v29 = vshrl.u32 %v54_v25, 15 }
  0x23   :  { %v59_v30 = vshrl.u32 %v55_v26, 15  ;;  %v60_v31 = vshrl.u32 %v56_v27, 15 }
  0x24   :  { %v61_v32 = vxor.u32 %v57_v28, %v53_v24  ;;  %v62_v33 = vxor.u32 %v58_v29, %v54_v25 }
  0x25   :  { %v63_v34 = vxor.u32 %v59_v30, %v55_v26  ;;  %v64_v35 = vxor.u32 %v60_v31, %v56_v27 }
  0x26   :  { %v65_v36 = vmul.u32 2221713035, %v61_v32  ;;  %v66_v37 = vmul.u32 2221713035, %v62_v33 }
  0x27   :  { %v67_v38 = vmul.u32 2221713035, %v63_v34  ;;  %v68_v39 = vmul.u32 2221713035, %v64_v35 }
  0x28   :  { %v69_v40 = vshrl.u32 %v65_v36, 16  ;;  %v70_v41 = vshrl.u32 %v66_v37, 16 }
  0x29   :  { %v71_v44 = vshrl.u32 %v67_v38, 16  ;;  %v72_v45 = vshrl.u32 %v68_v39, 16 }
  0x2a   :  { %v73_v46 = vxor.u32 %v69_v40, %v65_v36  ;;  %v74_v47 = vxor.u32 %v70_v41, %v66_v37 }
  0x2b   :  { %v75_v50 = vxor.u32 %v71_v44, %v67_v38  ;;  %v76_v51 = vxor.u32 %v72_v45, %v68_v39 }
  0x2c   :  { %v77_v52 = vshrl.u32 %v73_v46, 8  ;;  %v78_v54 = vshrl.u32 %v74_v47, 8 }
  0x2d   :  { %v79_v56 = vshrl.u32 %v75_v50, 8  ;;  %v80_v58 = vshrl.u32 %v76_v51, 8 }
  0x2e   :  { %v81_v60 = vcvt.s32.f32 %v77_v52  ;;  %v82_v61 = vcvt.s32.f32 %v78_v54 }
  0x2f   :  { %v83_v62 = vcvt.s32.f32 %v79_v56  ;;  %v84_v63 = vcvt.s32.f32 %v80_v58 }
  0x30   :  { %vm93_vm0 = vcmp.lt.f32.partialorder %v81_v60, %v89_v53  ;;  %vm94_vm1 = vcmp.lt.f32.partialorder %v82_v61, %v90_v55 }
  0x31   :  { %v124_v1 = vsel %vm93_vm0, 1.0, %v181_v0  ;;  %v125_v2 = vsel %vm94_vm1, 1.0, %v181_v0  ;;  %vm95_vm2 = vcmp.lt.f32.partialorder %v83_v62, %v91_v57  ;;  %vm96_vm3 = vcmp.lt.f32.partialorder %v84_v63, %v92_v59 }
  0x32   :  { %105 = vst [vmem:[#allocation7] sm:$0xff] %v124_v1  ;;  %106 = vst [vmem:[#allocation7 + $0x8] sm:$0xff] %v125_v2  ;;  %v126_v3 = vsel %vm95_vm2, 1.0, %v181_v0  ;;  %v127_v4 = vsel %vm96_vm3, 1.0, %v181_v0 }
  0x33   :  { %107 = vst [vmem:[#allocation7 + $0x10] sm:$0xff] %v126_v3  ;;  %108 = vst [vmem:[#allocation7 + $0x18] sm:$0xff] %v127_v4 }
  0x34   :  { %164 = shalt.err (!%p161_p12)
}
  0x35   :  { %s165_s27 = scalar_lea.hbm %s226_s2, 512 }
  0x36   :  { %p166_p13 = scmp.ne.s32.totalorder %s226_s2, %s165_s27  ;;  %p169_p0 = scmp.lt.u32.totalorder %s165_s27, %s226_s2 }
  0x38   :  { %p171_p1 = pnand %p169_p0, %p166_p13 }
  0x3a   :  { %174 = shalt.err (!%p171_p1)
}
  0x3b   :  { %118 = dma.vmem_to_hbm [thread:$0]  %s116_s1, 512, %s226_s2, [#allocation6]  }
  0x3c   :  { %177 = dma.done.wait [#allocation6], 512  }
  0x3d   :  { %178 = vsyncadd [#allocation6], 4294966784 }
  0x3e   :  { %122 = vsyncpa [#allocation5], 1 }
  0x3f   :  { %123 = vsyncpa [#allocation6], 1 }

</bundles_post_ra>
